<compile_context>
chip_gen: v6e
topology: v6e:2x2x1
jax: 0.10.0
libtpu: 0.0.40
codegen_flags: <defaults>
</compile_context>

<pallas_src>
import functools
import math

import jax
import jax.numpy as jnp
from jax import lax
from jax.experimental import pallas as pl
from jax.experimental.pallas import tpu as pltpu

EPS = 1e-5
NEG_SLOPE = 0.2
LANES = 128


def _round_up(x, m):
    return ((x + m - 1) // m) * m


# --------------------------------------------------------------------------
# Pass 1: fused-im2col conv tile + per-(sample, channel) statistics.
# --------------------------------------------------------------------------
def _conv_stats_kernel(x_ref, w_ref, mask_ref, y_ref, mean_ref, rstd_ref,
                       sum_sc, ssq_sc, *, tap_offsets, tp, count):
    # x_ref:    (1, 1, Cin, CL)   bf16 flattened padded-input chunk (incl. halo)
    # w_ref:    (KK, TCout, Cin)  bf16 per-tap conv weights
    # mask_ref: (1, TP)           f32 {0,1} validity mask of output positions
    # y_ref:    (1, TCout, TP)    f32 unnormalized conv output tile (streamed out)
    # mean_ref, rstd_ref: (1, TCout, 1) f32, written on the last P tile only
    # sum_sc, ssq_sc: (TCout, 128) f32 lane-partial accumulators (scratch)
    p = pl.program_id(2)

    @pl.when(p == 0)
    def _():
        sum_sc[...] = jnp.zeros_like(sum_sc)
        ssq_sc[...] = jnp.zeros_like(ssq_sc)

    # Conv as kh*kw accumulated matmuls on statically-shifted slices.  The
    # accumulator is the (pipelined) output tile itself, so vreg pressure
    # stays bounded for any (TCout, TP).
    for t, off in enumerate(tap_offsets):
        part = jnp.dot(w_ref[t], x_ref[0, 0, :, off:off + tp],
                       preferred_element_type=jnp.float32)
        if t == 0:
            y_ref[0] = part
        else:
            y_ref[0] += part

    # Lane-partial statistics: accumulate (TCout, 128) partials per tile;
    # the single cross-lane reduction happens once, in the epilogue.
    s_acc = sum_sc[...]
    q_acc = ssq_sc[...]
    for k in range(tp // LANES):
        sl = slice(k * LANES, (k + 1) * LANES)
        v = y_ref[0, :, sl] * mask_ref[:, sl]          # junk columns -> 0
        s_acc = s_acc + v
        q_acc = q_acc + v * v
    sum_sc[...] = s_acc
    ssq_sc[...] = q_acc

    @pl.when(p == pl.num_programs(2) - 1)
    def _():
        inv_n = 1.0 / float(count)
        s = jnp.sum(sum_sc[...], axis=1, keepdims=True)      # (TCout, 1)
        q = jnp.sum(ssq_sc[...], axis=1, keepdims=True)
        mean = s * inv_n
        var = q * inv_n - mean * mean
        var = jnp.maximum(var, 0.0)                          # guard cancellation
        mean_ref[0] = mean
        rstd_ref[0] = lax.rsqrt(var + EPS)


# --------------------------------------------------------------------------
# Pass 2: normalize + LeakyReLU, fully tiled / pipelined.
# --------------------------------------------------------------------------
def _norm_act_kernel(y_ref, mean_ref, rstd_ref, o_ref):
    z = (y_ref[0] - mean_ref[0]) * rstd_ref[0]
    o_ref[0] = jnp.where(z >= 0, z, NEG_SLOPE * z)


# --------------------------------------------------------------------------
# Tiling helpers.
# --------------------------------------------------------------------------
def _choose_p_tile(p_dense, max_tile=4096):
    # Lane-dense tiles (multiple of 128); large enough to amortize per-step
    # overhead, small enough to bound vreg/VMEM pressure on any chip.
    return min(_round_up(p_dense, LANES), max_tile)


def _choose_cout_tile(cout, max_tile=128):
    if cout <= max_tile or cout % 8 != 0:
        return cout
    tc = max_tile - (max_tile % 8)
    while cout % tc != 0:
        tc -= 8
    return max(tc, 8)


def _vmem_limit_bytes(block_bytes, scratch_bytes=0):
    # Double-buffered blocks + scratch + margin; floor at 32 MiB (>= every
    # chip's default scoped limit), cap at 64 MiB (v7x physical VMEM per TC).
    total = 2 * int(sum(block_bytes)) + int(scratch_bytes) + (2 << 20)
    return int(min(max(total, 32 << 20), 64 << 20))


# --------------------------------------------------------------------------
# Wrapper.
# --------------------------------------------------------------------------
def conv_norm_relu(x, weight, stride=1, padding=0):
    """x: (N, Cin, H, W) f32, weight: (Cout, Cin, kh, kw) f32 -> (N, Cout, Ho, Wo) f32."""
    n, cin, h, w = x.shape
    cout, cin_w, kh, kw = weight.shape
    assert cin_w == cin
    if padding > 0:
        assert padding < h and padding < w, "reflect padding must be < spatial dims"

    hp, wp = h + 2 * padding, w + 2 * padding
    ho_d, wo_d = hp - kh + 1, wp - kw + 1                  # dense (stride-1) extents
    ho = (h + 2 * padding - kh) // stride + 1
    wo = (w + 2 * padding - kw) // stride + 1
    assert ho_d >= 1 and wo_d >= 1

    # ---- cheap host-side prep (no 9x im2col expansion) ----------------------
    xb = x.astype(jnp.bfloat16)
    if padding > 0:
        xb = jnp.pad(xb, ((0, 0), (0, 0), (padding, padding), (padding, padding)),
                     mode="reflect")
    xf = xb.reshape(n, cin, hp * wp)                        # flattened padded input

    # Conv is evaluated densely over the padded width (wrap-around "junk"
    # columns are masked out of the stats and sliced away at the end).
    p_dense = ho_d * wp
    tp = _choose_p_tile(p_dense)
    n_ptiles = pl.cdiv(p_dense, tp)
    p_pad = n_ptiles * tp
    halo = (kh - 1) * wp + (kw - 1)
    cl = _round_up(tp + halo, LANES)                        # chunk length incl. halo
    lin = (n_ptiles - 1) * tp + cl
    xf = jnp.pad(xf, ((0, 0), (0, 0), (0, lin - hp * wp)))
    # Overlapping chunks; only the small halo is duplicated in HBM.
    x_chunks = jnp.stack([xf[:, :, c * tp:c * tp + cl] for c in range(n_ptiles)],
                         axis=1)                            # (N, n_ptiles, Cin, CL)

    kk = kh * kw
    w_taps = jnp.transpose(weight, (2, 3, 0, 1)).reshape(kk, cout, cin)
    w_taps = w_taps.astype(jnp.bfloat16)                    # (KK, Cout, Cin)
    tap_offsets = tuple(i * wp + j for i in range(kh) for j in range(kw))

    # Validity mask over the dense/padded output positions (stride + junk cols).
    rows = jnp.arange(ho_d)[:, None]
    cols = jnp.arange(wp)[None, :]
    valid = (cols < wo_d) & (rows % stride == 0) & (cols % stride == 0)
    mask = jnp.pad(valid.astype(jnp.float32).reshape(-1), (0, p_pad - p_dense))
    mask = mask.reshape(1, p_pad)

    tcout = _choose_cout_tile(cout)
    n_ctiles = cout // tcout
    count = ho * wo                                         # valid positions per channel

    kernel1 = functools.partial(_conv_stats_kernel, tap_offsets=tap_offsets,
                                tp=tp, count=count)

    vmem1 = _vmem_limit_bytes(
        [cin * cl * 2, kk * tcout * cin * 2, tp * 4, tcout * tp * 4,
         2 * max(tcout, 8) * LANES * 4],
        scratch_bytes=2 * max(tcout, 8) * LANES * 4)

    y_conv, mean, rstd = pl.pallas_call(
        kernel1,
        out_shape=(jax.ShapeDtypeStruct((n, cout, p_pad), jnp.float32),
                   jax.ShapeDtypeStruct((n, cout, 1), jnp.float32),
                   jax.ShapeDtypeStruct((n, cout, 1), jnp.float32)),
        grid_spec=pltpu.PrefetchScalarGridSpec(
            num_scalar_prefetch=0,
            grid=(n, n_ctiles, n_ptiles),
            in_specs=[
                pl.BlockSpec((1, 1, cin, cl), lambda b, c, p: (b, p, 0, 0)),
                pl.BlockSpec((kk, tcout, cin), lambda b, c, p: (0, c, 0)),
                pl.BlockSpec((1, tp), lambda b, c, p: (0, p)),
            ],
            out_specs=[
                pl.BlockSpec((1, tcout, tp), lambda b, c, p: (b, c, p)),
                pl.BlockSpec((1, tcout, 1), lambda b, c, p: (b, c, 0)),
                pl.BlockSpec((1, tcout, 1), lambda b, c, p: (b, c, 0)),
            ],
            scratch_shapes=[pltpu.VMEM((tcout, LANES), jnp.float32),
                            pltpu.VMEM((tcout, LANES), jnp.float32)],
        ),
        compiler_params=pltpu.CompilerParams(
            dimension_semantics=("parallel", "parallel", "arbitrary"),
            vmem_limit_bytes=vmem1),
    )(x_chunks, w_taps, mask)

    vmem2 = _vmem_limit_bytes(
        [tcout * tp * 4, max(tcout, 8) * LANES * 4, max(tcout, 8) * LANES * 4,
         tcout * tp * 4])

    out_flat = pl.pallas_call(
        _norm_act_kernel,
        out_shape=jax.ShapeDtypeStruct((n, cout, p_pad), jnp.float32),
        grid_spec=pltpu.PrefetchScalarGridSpec(
            num_scalar_prefetch=0,
            grid=(n, n_ctiles, n_ptiles),
            in_specs=[
                pl.BlockSpec((1, tcout, tp), lambda b, c, p: (b, c, p)),
                pl.BlockSpec((1, tcout, 1), lambda b, c, p: (b, c, 0)),
                pl.BlockSpec((1, tcout, 1), lambda b, c, p: (b, c, 0)),
            ],
            out_specs=pl.BlockSpec((1, tcout, tp), lambda b, c, p: (b, c, p)),
        ),
        compiler_params=pltpu.CompilerParams(
            dimension_semantics=("parallel", "parallel", "parallel"),
            vmem_limit_bytes=vmem2),
    )(y_conv, mean, rstd)

    # Extract valid (strided, non-junk) positions; output is already NCHW.
    out = out_flat[:, :, :p_dense].reshape(n, cout, ho_d, wp)
    out = out[:, :, ::stride, :wo_d:stride]
    return out


if __name__ == "__main__":
    # Module config: Conv_Norm_ReLU(in_channel=4, out_channel=8, kernel_size=3,
    #                               stride=1, padding=1, bias=False)
    N, C_IN, H, W = 2, 4, 16, 16
    C_OUT, K_SIZE, STRIDE, PAD = 8, 3, 1, 1

    key = jax.random.PRNGKey(0)
    kx, kw_key = jax.random.split(key)
    x = jax.random.normal(kx, (N, C_IN, H, W), dtype=jnp.float32)

    fan_in = C_IN * K_SIZE * K_SIZE
    bound = 1.0 / math.sqrt(fan_in)
    weight = jax.random.uniform(kw_key, (C_OUT, C_IN, K_SIZE, K_SIZE),
                                dtype=jnp.float32, minval=-bound, maxval=bound)

    y = conv_norm_relu(x, weight, stride=STRIDE, padding=PAD)
    jax.block_until_ready(y)
    assert y.shape == (N, C_OUT, H, W)
    assert bool(jnp.all(jnp.isfinite(y)))

    # Reference: f32 math on bf16-rounded inputs (matching the kernel's MXU inputs).
    xr = x.astype(jnp.bfloat16).astype(jnp.float32)
    wr = weight.astype(jnp.bfloat16).astype(jnp.float32)
    xp = jnp.pad(xr, ((0, 0), (0, 0), (PAD, PAD), (PAD, PAD)), mode="reflect")
    conv = lax.conv_general_dilated(
        xp, wr, window_strides=(STRIDE, STRIDE), padding="VALID",
        dimension_numbers=("NCHW", "OIHW", "NCHW"),
        precision=lax.Precision.HIGHEST)
    mu = conv.mean(axis=(2, 3), keepdims=True)
    var = conv.var(axis=(2, 3), keepdims=True)
    ref = (conv - mu) * lax.rsqrt(var + EPS)
    ref = jnp.where(ref >= 0, ref, NEG_SLOPE * ref)
    err = float(jnp.max(jnp.abs(y - ref)))
    assert err < 1e-2, f"max abs error vs reference: {err}"
    print("KERNEL_OK")
</pallas_src>

<mosaic_0001>
module attributes {stable_mosaic.version = 11 : i64} {
  func.func @_conv_stats_kernel(%arg0: i32, %arg1: i32, %arg2: i32, %arg3: memref<1x1x4x512xbf16, #tpu.memory_space<vmem>>, %arg4: memref<9x8x4xbf16, #tpu.memory_space<vmem>>, %arg5: memref<1x384xf32, #tpu.memory_space<vmem>>, %arg6: memref<1x8x384xf32, #tpu.memory_space<vmem>>, %arg7: memref<1x8x1xf32, #tpu.memory_space<vmem>>, %arg8: memref<1x8x1xf32, #tpu.memory_space<vmem>>, %arg9: memref<8x128xf32, #tpu.memory_space<vmem>>, %arg10: memref<8x128xf32, #tpu.memory_space<vmem>>) attributes {dimension_semantics = [#tpu.dimension_semantics<parallel>, #tpu.dimension_semantics<parallel>, #tpu.dimension_semantics<arbitrary>], iteration_bounds = array<i64: 2, 1, 1>, scalar_prefetch = 0 : i64, scratch_operands = 2 : i64, tpu.core_type = #tpu.core_type<tc>, window_params = [{transform_indices = @transform_0, window_bounds = array<i64: 1, 1, 4, 512>}, {transform_indices = @transform_1, window_bounds = array<i64: 9, 8, 4>}, {transform_indices = @transform_2, window_bounds = array<i64: 1, 384>}, {transform_indices = @transform_3, window_bounds = array<i64: 1, 8, 384>}, {transform_indices = @transform_4, window_bounds = array<i64: 1, 8, 1>}, {transform_indices = @transform_5, window_bounds = array<i64: 1, 8, 1>}]} {
    %c0_i32 = arith.constant 0 : i32
    %0 = arith.cmpi eq, %arg2, %c0_i32 : i32
    %1 = arith.extui %0 : i1 to i32
    %c0_i32_0 = arith.constant 0 : i32
    %2 = arith.cmpi ne, %1, %c0_i32_0 : i32
    scf.if %2 {
      %cst_131 = arith.constant 0.000000e+00 : f32
      %130 = vector.broadcast %cst_131 : f32 to vector<8x128xf32>
      %c0_132 = arith.constant 0 : index
      %c0_133 = arith.constant 0 : index
      %131 = vector.load %arg9[%c0_132, %c0_133] : memref<8x128xf32, #tpu.memory_space<vmem>>, vector<8x128xf32>
      tpu.vector_store %arg9[%c0_132, %c0_133], %130 {strides = array<i32>} : memref<8x128xf32, #tpu.memory_space<vmem>>, vector<8x128xf32>,
      %cst_134 = arith.constant 0.000000e+00 : f32
      %132 = vector.broadcast %cst_134 : f32 to vector<8x128xf32>
      %c0_135 = arith.constant 0 : index
      %c0_136 = arith.constant 0 : index
      %133 = vector.load %arg10[%c0_135, %c0_136] : memref<8x128xf32, #tpu.memory_space<vmem>>, vector<8x128xf32>
      tpu.vector_store %arg10[%c0_135, %c0_136], %132 {strides = array<i32>} : memref<8x128xf32, #tpu.memory_space<vmem>>, vector<8x128xf32>,
    } else {
    }
    %c0 = arith.constant 0 : index
    %c0_1 = arith.constant 0 : index
    %c0_2 = arith.constant 0 : index
    %3 = vector.load %arg4[%c0, %c0_1, %c0_2] : memref<9x8x4xbf16, #tpu.memory_space<vmem>>, vector<1x8x4xbf16>
    %4 = vector.shape_cast %3 : vector<1x8x4xbf16> to vector<8x4xbf16>
    %c0_3 = arith.constant 0 : index
    %c0_4 = arith.constant 0 : index
    %c0_5 = arith.constant 0 : index
    %c0_6 = arith.constant 0 : index
    %5 = vector.load %arg3[%c0_3, %c0_4, %c0_5, %c0_6] : memref<1x1x4x512xbf16, #tpu.memory_space<vmem>>, vector<1x1x4x384xbf16>
    %6 = vector.shape_cast %5 : vector<1x1x4x384xbf16> to vector<4x384xbf16>
    %cst = arith.constant dense<0.000000e+00> : vector<8x384xf32>
    %7 = tpu.matmul %4, %6, %cst {dimension_numbers = #tpu.dot_dimension_numbers<[1], [0], [0], [1], [0, 0, 1, 1], [], []>} : vector<8x4xbf16>, vector<4x384xbf16>, vector<8x384xf32> -> vector<8x384xf32>
    %c0_7 = arith.constant 0 : index
    %c0_8 = arith.constant 0 : index
    %c0_9 = arith.constant 0 : index
    %8 = vector.load %arg6[%c0_7, %c0_8, %c0_9] : memref<1x8x384xf32, #tpu.memory_space<vmem>>, vector<1x8x384xf32>
    %9 = vector.shape_cast %8 : vector<1x8x384xf32> to vector<8x384xf32>
    %10 = vector.shape_cast %7 : vector<8x384xf32> to vector<1x8x384xf32>
    tpu.vector_store %arg6[%c0_7, %c0_8, %c0_9], %10 {strides = array<i32>} : memref<1x8x384xf32, #tpu.memory_space<vmem>>, vector<1x8x384xf32>,
    %c1 = arith.constant 1 : index
    %c0_10 = arith.constant 0 : index
    %c0_11 = arith.constant 0 : index
    %11 = vector.load %arg4[%c1, %c0_10, %c0_11] : memref<9x8x4xbf16, #tpu.memory_space<vmem>>, vector<1x8x4xbf16>
    %12 = vector.shape_cast %11 : vector<1x8x4xbf16> to vector<8x4xbf16>
    %c0_12 = arith.constant 0 : index
    %c0_13 = arith.constant 0 : index
    %c0_14 = arith.constant 0 : index
    %c1_15 = arith.constant 1 : index
    %13 = vector.load %arg3[%c0_12, %c0_13, %c0_14, %c1_15] : memref<1x1x4x512xbf16, #tpu.memory_space<vmem>>, vector<1x1x4x384xbf16>
    %14 = vector.shape_cast %13 : vector<1x1x4x384xbf16> to vector<4x384xbf16>
    %cst_16 = arith.constant dense<0.000000e+00> : vector<8x384xf32>
    %15 = tpu.matmul %12, %14, %cst_16 {dimension_numbers = #tpu.dot_dimension_numbers<[1], [0], [0], [1], [0, 0, 1, 1], [], []>} : vector<8x4xbf16>, vector<4x384xbf16>, vector<8x384xf32> -> vector<8x384xf32>
    %c0_17 = arith.constant 0 : index
    %c0_18 = arith.constant 0 : index
    %c0_19 = arith.constant 0 : index
    %16 = vector.load %arg6[%c0_17, %c0_18, %c0_19] : memref<1x8x384xf32, #tpu.memory_space<vmem>>, vector<1x8x384xf32>
    %17 = vector.shape_cast %16 : vector<1x8x384xf32> to vector<8x384xf32>
    %18 = arith.addf %17, %15 : vector<8x384xf32>
    %c0_20 = arith.constant 0 : index
    %c0_21 = arith.constant 0 : index
    %c0_22 = arith.constant 0 : index
    %19 = vector.load %arg6[%c0_20, %c0_21, %c0_22] : memref<1x8x384xf32, #tpu.memory_space<vmem>>, vector<1x8x384xf32>
    %20 = vector.shape_cast %19 : vector<1x8x384xf32> to vector<8x384xf32>
    %21 = vector.shape_cast %18 : vector<8x384xf32> to vector<1x8x384xf32>
    tpu.vector_store %arg6[%c0_20, %c0_21, %c0_22], %21 {strides = array<i32>} : memref<1x8x384xf32, #tpu.memory_space<vmem>>, vector<1x8x384xf32>,
    %c2 = arith.constant 2 : index
    %c0_23 = arith.constant 0 : index
    %c0_24 = arith.constant 0 : index
    %22 = vector.load %arg4[%c2, %c0_23, %c0_24] : memref<9x8x4xbf16, #tpu.memory_space<vmem>>, vector<1x8x4xbf16>
    %23 = vector.shape_cast %22 : vector<1x8x4xbf16> to vector<8x4xbf16>
    %c0_25 = arith.constant 0 : index
    %c0_26 = arith.constant 0 : index
    %c0_27 = arith.constant 0 : index
    %c2_28 = arith.constant 2 : index
    %24 = vector.load %arg3[%c0_25, %c0_26, %c0_27, %c2_28] : memref<1x1x4x512xbf16, #tpu.memory_space<vmem>>, vector<1x1x4x384xbf16>
    %25 = vector.shape_cast %24 : vector<1x1x4x384xbf16> to vector<4x384xbf16>
    %cst_29 = arith.constant dense<0.000000e+00> : vector<8x384xf32>
    %26 = tpu.matmul %23, %25, %cst_29 {dimension_numbers = #tpu.dot_dimension_numbers<[1], [0], [0], [1], [0, 0, 1, 1], [], []>} : vector<8x4xbf16>, vector<4x384xbf16>, vector<8x384xf32> -> vector<8x384xf32>
    %c0_30 = arith.constant 0 : index
    %c0_31 = arith.constant 0 : index
    %c0_32 = arith.constant 0 : index
    %27 = vector.load %arg6[%c0_30, %c0_31, %c0_32] : memref<1x8x384xf32, #tpu.memory_space<vmem>>, vector<1x8x384xf32>
    %28 = vector.shape_cast %27 : vector<1x8x384xf32> to vector<8x384xf32>
    %29 = arith.addf %28, %26 : vector<8x384xf32>
    %c0_33 = arith.constant 0 : index
    %c0_34 = arith.constant 0 : index
    %c0_35 = arith.constant 0 : index
    %30 = vector.load %arg6[%c0_33, %c0_34, %c0_35] : memref<1x8x384xf32, #tpu.memory_space<vmem>>, vector<1x8x384xf32>
    %31 = vector.shape_cast %30 : vector<1x8x384xf32> to vector<8x384xf32>
    %32 = vector.shape_cast %29 : vector<8x384xf32> to vector<1x8x384xf32>
    tpu.vector_store %arg6[%c0_33, %c0_34, %c0_35], %32 {strides = array<i32>} : memref<1x8x384xf32, #tpu.memory_space<vmem>>, vector<1x8x384xf32>,
    %c3 = arith.constant 3 : index
    %c0_36 = arith.constant 0 : index
    %c0_37 = arith.constant 0 : index
    %33 = vector.load %arg4[%c3, %c0_36, %c0_37] : memref<9x8x4xbf16, #tpu.memory_space<vmem>>, vector<1x8x4xbf16>
    %34 = vector.shape_cast %33 : vector<1x8x4xbf16> to vector<8x4xbf16>
    %c0_38 = arith.constant 0 : index
    %c0_39 = arith.constant 0 : index
    %c0_40 = arith.constant 0 : index
    %c18 = arith.constant 18 : index
    %35 = vector.load %arg3[%c0_38, %c0_39, %c0_40, %c18] : memref<1x1x4x512xbf16, #tpu.memory_space<vmem>>, vector<1x1x4x384xbf16>
    %36 = vector.shape_cast %35 : vector<1x1x4x384xbf16> to vector<4x384xbf16>
    %cst_41 = arith.constant dense<0.000000e+00> : vector<8x384xf32>
    %37 = tpu.matmul %34, %36, %cst_41 {dimension_numbers = #tpu.dot_dimension_numbers<[1], [0], [0], [1], [0, 0, 1, 1], [], []>} : vector<8x4xbf16>, vector<4x384xbf16>, vector<8x384xf32> -> vector<8x384xf32>
    %c0_42 = arith.constant 0 : index
    %c0_43 = arith.constant 0 : index
    %c0_44 = arith.constant 0 : index
    %38 = vector.load %arg6[%c0_42, %c0_43, %c0_44] : memref<1x8x384xf32, #tpu.memory_space<vmem>>, vector<1x8x384xf32>
    %39 = vector.shape_cast %38 : vector<1x8x384xf32> to vector<8x384xf32>
    %40 = arith.addf %39, %37 : vector<8x384xf32>
    %c0_45 = arith.constant 0 : index
    %c0_46 = arith.constant 0 : index
    %c0_47 = arith.constant 0 : index
    %41 = vector.load %arg6[%c0_45, %c0_46, %c0_47] : memref<1x8x384xf32, #tpu.memory_space<vmem>>, vector<1x8x384xf32>
    %42 = vector.shape_cast %41 : vector<1x8x384xf32> to vector<8x384xf32>
    %43 = vector.shape_cast %40 : vector<8x384xf32> to vector<1x8x384xf32>
    tpu.vector_store %arg6[%c0_45, %c0_46, %c0_47], %43 {strides = array<i32>} : memref<1x8x384xf32, #tpu.memory_space<vmem>>, vector<1x8x384xf32>,
    %c4 = arith.constant 4 : index
    %c0_48 = arith.constant 0 : index
    %c0_49 = arith.constant 0 : index
    %44 = vector.load %arg4[%c4, %c0_48, %c0_49] : memref<9x8x4xbf16, #tpu.memory_space<vmem>>, vector<1x8x4xbf16>
    %45 = vector.shape_cast %44 : vector<1x8x4xbf16> to vector<8x4xbf16>
    %c0_50 = arith.constant 0 : index
    %c0_51 = arith.constant 0 : index
    %c0_52 = arith.constant 0 : index
    %c19 = arith.constant 19 : index
    %46 = vector.load %arg3[%c0_50, %c0_51, %c0_52, %c19] : memref<1x1x4x512xbf16, #tpu.memory_space<vmem>>, vector<1x1x4x384xbf16>
    %47 = vector.shape_cast %46 : vector<1x1x4x384xbf16> to vector<4x384xbf16>
    %cst_53 = arith.constant dense<0.000000e+00> : vector<8x384xf32>
    %48 = tpu.matmul %45, %47, %cst_53 {dimension_numbers = #tpu.dot_dimension_numbers<[1], [0], [0], [1], [0, 0, 1, 1], [], []>} : vector<8x4xbf16>, vector<4x384xbf16>, vector<8x384xf32> -> vector<8x384xf32>
    %c0_54 = arith.constant 0 : index
    %c0_55 = arith.constant 0 : index
    %c0_56 = arith.constant 0 : index
    %49 = vector.load %arg6[%c0_54, %c0_55, %c0_56] : memref<1x8x384xf32, #tpu.memory_space<vmem>>, vector<1x8x384xf32>
    %50 = vector.shape_cast %49 : vector<1x8x384xf32> to vector<8x384xf32>
    %51 = arith.addf %50, %48 : vector<8x384xf32>
    %c0_57 = arith.constant 0 : index
    %c0_58 = arith.constant 0 : index
    %c0_59 = arith.constant 0 : index
    %52 = vector.load %arg6[%c0_57, %c0_58, %c0_59] : memref<1x8x384xf32, #tpu.memory_space<vmem>>, vector<1x8x384xf32>
    %53 = vector.shape_cast %52 : vector<1x8x384xf32> to vector<8x384xf32>
    %54 = vector.shape_cast %51 : vector<8x384xf32> to vector<1x8x384xf32>
    tpu.vector_store %arg6[%c0_57, %c0_58, %c0_59], %54 {strides = array<i32>} : memref<1x8x384xf32, #tpu.memory_space<vmem>>, vector<1x8x384xf32>,
    %c5 = arith.constant 5 : index
    %c0_60 = arith.constant 0 : index
    %c0_61 = arith.constant 0 : index
    %55 = vector.load %arg4[%c5, %c0_60, %c0_61] : memref<9x8x4xbf16, #tpu.memory_space<vmem>>, vector<1x8x4xbf16>
    %56 = vector.shape_cast %55 : vector<1x8x4xbf16> to vector<8x4xbf16>
    %c0_62 = arith.constant 0 : index
    %c0_63 = arith.constant 0 : index
    %c0_64 = arith.constant 0 : index
    %c20 = arith.constant 20 : index
    %57 = vector.load %arg3[%c0_62, %c0_63, %c0_64, %c20] : memref<1x1x4x512xbf16, #tpu.memory_space<vmem>>, vector<1x1x4x384xbf16>
    %58 = vector.shape_cast %57 : vector<1x1x4x384xbf16> to vector<4x384xbf16>
    %cst_65 = arith.constant dense<0.000000e+00> : vector<8x384xf32>
    %59 = tpu.matmul %56, %58, %cst_65 {dimension_numbers = #tpu.dot_dimension_numbers<[1], [0], [0], [1], [0, 0, 1, 1], [], []>} : vector<8x4xbf16>, vector<4x384xbf16>, vector<8x384xf32> -> vector<8x384xf32>
    %c0_66 = arith.constant 0 : index
    %c0_67 = arith.constant 0 : index
    %c0_68 = arith.constant 0 : index
    %60 = vector.load %arg6[%c0_66, %c0_67, %c0_68] : memref<1x8x384xf32, #tpu.memory_space<vmem>>, vector<1x8x384xf32>
    %61 = vector.shape_cast %60 : vector<1x8x384xf32> to vector<8x384xf32>
    %62 = arith.addf %61, %59 : vector<8x384xf32>
    %c0_69 = arith.constant 0 : index
    %c0_70 = arith.constant 0 : index
    %c0_71 = arith.constant 0 : index
    %63 = vector.load %arg6[%c0_69, %c0_70, %c0_71] : memref<1x8x384xf32, #tpu.memory_space<vmem>>, vector<1x8x384xf32>
    %64 = vector.shape_cast %63 : vector<1x8x384xf32> to vector<8x384xf32>
    %65 = vector.shape_cast %62 : vector<8x384xf32> to vector<1x8x384xf32>
    tpu.vector_store %arg6[%c0_69, %c0_70, %c0_71], %65 {strides = array<i32>} : memref<1x8x384xf32, #tpu.memory_space<vmem>>, vector<1x8x384xf32>,
    %c6 = arith.constant 6 : index
    %c0_72 = arith.constant 0 : index
    %c0_73 = arith.constant 0 : index
    %66 = vector.load %arg4[%c6, %c0_72, %c0_73] : memref<9x8x4xbf16, #tpu.memory_space<vmem>>, vector<1x8x4xbf16>
    %67 = vector.shape_cast %66 : vector<1x8x4xbf16> to vector<8x4xbf16>
    %c0_74 = arith.constant 0 : index
    %c0_75 = arith.constant 0 : index
    %c0_76 = arith.constant 0 : index
    %c36 = arith.constant 36 : index
    %68 = vector.load %arg3[%c0_74, %c0_75, %c0_76, %c36] : memref<1x1x4x512xbf16, #tpu.memory_space<vmem>>, vector<1x1x4x384xbf16>
    %69 = vector.shape_cast %68 : vector<1x1x4x384xbf16> to vector<4x384xbf16>
    %cst_77 = arith.constant dense<0.000000e+00> : vector<8x384xf32>
    %70 = tpu.matmul %67, %69, %cst_77 {dimension_numbers = #tpu.dot_dimension_numbers<[1], [0], [0], [1], [0, 0, 1, 1], [], []>} : vector<8x4xbf16>, vector<4x384xbf16>, vector<8x384xf32> -> vector<8x384xf32>
    %c0_78 = arith.constant 0 : index
    %c0_79 = arith.constant 0 : index
    %c0_80 = arith.constant 0 : index
    %71 = vector.load %arg6[%c0_78, %c0_79, %c0_80] : memref<1x8x384xf32, #tpu.memory_space<vmem>>, vector<1x8x384xf32>
    %72 = vector.shape_cast %71 : vector<1x8x384xf32> to vector<8x384xf32>
    %73 = arith.addf %72, %70 : vector<8x384xf32>
    %c0_81 = arith.constant 0 : index
    %c0_82 = arith.constant 0 : index
    %c0_83 = arith.constant 0 : index
    %74 = vector.load %arg6[%c0_81, %c0_82, %c0_83] : memref<1x8x384xf32, #tpu.memory_space<vmem>>, vector<1x8x384xf32>
    %75 = vector.shape_cast %74 : vector<1x8x384xf32> to vector<8x384xf32>
    %76 = vector.shape_cast %73 : vector<8x384xf32> to vector<1x8x384xf32>
    tpu.vector_store %arg6[%c0_81, %c0_82, %c0_83], %76 {strides = array<i32>} : memref<1x8x384xf32, #tpu.memory_space<vmem>>, vector<1x8x384xf32>,
    %c7 = arith.constant 7 : index
    %c0_84 = arith.constant 0 : index
    %c0_85 = arith.constant 0 : index
    %77 = vector.load %arg4[%c7, %c0_84, %c0_85] : memref<9x8x4xbf16, #tpu.memory_space<vmem>>, vector<1x8x4xbf16>
    %78 = vector.shape_cast %77 : vector<1x8x4xbf16> to vector<8x4xbf16>
    %c0_86 = arith.constant 0 : index
    %c0_87 = arith.constant 0 : index
    %c0_88 = arith.constant 0 : index
    %c37 = arith.constant 37 : index
    %79 = vector.load %arg3[%c0_86, %c0_87, %c0_88, %c37] : memref<1x1x4x512xbf16, #tpu.memory_space<vmem>>, vector<1x1x4x384xbf16>
    %80 = vector.shape_cast %79 : vector<1x1x4x384xbf16> to vector<4x384xbf16>
    %cst_89 = arith.constant dense<0.000000e+00> : vector<8x384xf32>
    %81 = tpu.matmul %78, %80, %cst_89 {dimension_numbers = #tpu.dot_dimension_numbers<[1], [0], [0], [1], [0, 0, 1, 1], [], []>} : vector<8x4xbf16>, vector<4x384xbf16>, vector<8x384xf32> -> vector<8x384xf32>
    %c0_90 = arith.constant 0 : index
    %c0_91 = arith.constant 0 : index
    %c0_92 = arith.constant 0 : index
    %82 = vector.load %arg6[%c0_90, %c0_91, %c0_92] : memref<1x8x384xf32, #tpu.memory_space<vmem>>, vector<1x8x384xf32>
    %83 = vector.shape_cast %82 : vector<1x8x384xf32> to vector<8x384xf32>
    %84 = arith.addf %83, %81 : vector<8x384xf32>
    %c0_93 = arith.constant 0 : index
    %c0_94 = arith.constant 0 : index
    %c0_95 = arith.constant 0 : index
    %85 = vector.load %arg6[%c0_93, %c0_94, %c0_95] : memref<1x8x384xf32, #tpu.memory_space<vmem>>, vector<1x8x384xf32>
    %86 = vector.shape_cast %85 : vector<1x8x384xf32> to vector<8x384xf32>
    %87 = vector.shape_cast %84 : vector<8x384xf32> to vector<1x8x384xf32>
    tpu.vector_store %arg6[%c0_93, %c0_94, %c0_95], %87 {strides = array<i32>} : memref<1x8x384xf32, #tpu.memory_space<vmem>>, vector<1x8x384xf32>,
    %c8 = arith.constant 8 : index
    %c0_96 = arith.constant 0 : index
    %c0_97 = arith.constant 0 : index
    %88 = vector.load %arg4[%c8, %c0_96, %c0_97] : memref<9x8x4xbf16, #tpu.memory_space<vmem>>, vector<1x8x4xbf16>
    %89 = vector.shape_cast %88 : vector<1x8x4xbf16> to vector<8x4xbf16>
    %c0_98 = arith.constant 0 : index
    %c0_99 = arith.constant 0 : index
    %c0_100 = arith.constant 0 : index
    %c38 = arith.constant 38 : index
    %90 = vector.load %arg3[%c0_98, %c0_99, %c0_100, %c38] : memref<1x1x4x512xbf16, #tpu.memory_space<vmem>>, vector<1x1x4x384xbf16>
    %91 = vector.shape_cast %90 : vector<1x1x4x384xbf16> to vector<4x384xbf16>
    %cst_101 = arith.constant dense<0.000000e+00> : vector<8x384xf32>
    %92 = tpu.matmul %89, %91, %cst_101 {dimension_numbers = #tpu.dot_dimension_numbers<[1], [0], [0], [1], [0, 0, 1, 1], [], []>} : vector<8x4xbf16>, vector<4x384xbf16>, vector<8x384xf32> -> vector<8x384xf32>
    %c0_102 = arith.constant 0 : index
    %c0_103 = arith.constant 0 : index
    %c0_104 = arith.constant 0 : index
    %93 = vector.load %arg6[%c0_102, %c0_103, %c0_104] : memref<1x8x384xf32, #tpu.memory_space<vmem>>, vector<1x8x384xf32>
    %94 = vector.shape_cast %93 : vector<1x8x384xf32> to vector<8x384xf32>
    %95 = arith.addf %94, %92 : vector<8x384xf32>
    %c0_105 = arith.constant 0 : index
    %c0_106 = arith.constant 0 : index
    %c0_107 = arith.constant 0 : index
    %96 = vector.load %arg6[%c0_105, %c0_106, %c0_107] : memref<1x8x384xf32, #tpu.memory_space<vmem>>, vector<1x8x384xf32>
    %97 = vector.shape_cast %96 : vector<1x8x384xf32> to vector<8x384xf32>
    %98 = vector.shape_cast %95 : vector<8x384xf32> to vector<1x8x384xf32>
    tpu.vector_store %arg6[%c0_105, %c0_106, %c0_107], %98 {strides = array<i32>} : memref<1x8x384xf32, #tpu.memory_space<vmem>>, vector<1x8x384xf32>,
    %c0_108 = arith.constant 0 : index
    %c0_109 = arith.constant 0 : index
    %99 = vector.load %arg9[%c0_108, %c0_109] : memref<8x128xf32, #tpu.memory_space<vmem>>, vector<8x128xf32>
    %c0_110 = arith.constant 0 : index
    %c0_111 = arith.constant 0 : index
    %100 = vector.load %arg10[%c0_110, %c0_111] : memref<8x128xf32, #tpu.memory_space<vmem>>, vector<8x128xf32>
    %c0_112 = arith.constant 0 : index
    %c0_113 = arith.constant 0 : index
    %c0_114 = arith.constant 0 : index
    %101 = vector.load %arg6[%c0_112, %c0_113, %c0_114] : memref<1x8x384xf32, #tpu.memory_space<vmem>>, vector<1x8x128xf32>
    %102 = vector.shape_cast %101 : vector<1x8x128xf32> to vector<8x128xf32>
    %c0_115 = arith.constant 0 : index
    %c0_116 = arith.constant 0 : index
    %103 = vector.load %arg5[%c0_115, %c0_116] : memref<1x384xf32, #tpu.memory_space<vmem>>, vector<1x128xf32>
    %104 = vector.broadcast %103 : vector<1x128xf32> to vector<8x128xf32>
    %105 = arith.mulf %102, %104 : vector<8x128xf32>
    %106 = arith.addf %99, %105 : vector<8x128xf32>
    %107 = arith.mulf %105, %105 : vector<8x128xf32>
    %108 = arith.addf %100, %107 : vector<8x128xf32>
    %c0_117 = arith.constant 0 : index
    %c0_118 = arith.constant 0 : index
    %c128 = arith.constant 128 : index
    %109 = vector.load %arg6[%c0_117, %c0_118, %c128] : memref<1x8x384xf32, #tpu.memory_space<vmem>>, vector<1x8x128xf32>
    %110 = vector.shape_cast %109 : vector<1x8x128xf32> to vector<8x128xf32>
    %c0_119 = arith.constant 0 : index
    %c128_120 = arith.constant 128 : index
    %111 = vector.load %arg5[%c0_119, %c128_120] : memref<1x384xf32, #tpu.memory_space<vmem>>, vector<1x128xf32>
    %112 = vector.broadcast %111 : vector<1x128xf32> to vector<8x128xf32>
    %113 = arith.mulf %110, %112 : vector<8x128xf32>
    %114 = arith.addf %106, %113 : vector<8x128xf32>
    %115 = arith.mulf %113, %113 : vector<8x128xf32>
    %116 = arith.addf %108, %115 : vector<8x128xf32>
    %c0_121 = arith.constant 0 : index
    %c0_122 = arith.constant 0 : index
    %c256 = arith.constant 256 : index
    %117 = vector.load %arg6[%c0_121, %c0_122, %c256] : memref<1x8x384xf32, #tpu.memory_space<vmem>>, vector<1x8x128xf32>
    %118 = vector.shape_cast %117 : vector<1x8x128xf32> to vector<8x128xf32>
    %c0_123 = arith.constant 0 : index
    %c256_124 = arith.constant 256 : index
    %119 = vector.load %arg5[%c0_123, %c256_124] : memref<1x384xf32, #tpu.memory_space<vmem>>, vector<1x128xf32>
    %120 = vector.broadcast %119 : vector<1x128xf32> to vector<8x128xf32>
    %121 = arith.mulf %118, %120 : vector<8x128xf32>
    %122 = arith.addf %114, %121 : vector<8x128xf32>
    %123 = arith.mulf %121, %121 : vector<8x128xf32>
    %124 = arith.addf %116, %123 : vector<8x128xf32>
    %c0_125 = arith.constant 0 : index
    %c0_126 = arith.constant 0 : index
    %125 = vector.load %arg9[%c0_125, %c0_126] : memref<8x128xf32, #tpu.memory_space<vmem>>, vector<8x128xf32>
    tpu.vector_store %arg9[%c0_125, %c0_126], %122 {strides = array<i32>} : memref<8x128xf32, #tpu.memory_space<vmem>>, vector<8x128xf32>,
    %c0_127 = arith.constant 0 : index
    %c0_128 = arith.constant 0 : index
    %126 = vector.load %arg10[%c0_127, %c0_128] : memref<8x128xf32, #tpu.memory_space<vmem>>, vector<8x128xf32>
    tpu.vector_store %arg10[%c0_127, %c0_128], %124 {strides = array<i32>} : memref<8x128xf32, #tpu.memory_space<vmem>>, vector<8x128xf32>,
    %c0_i32_129 = arith.constant 0 : i32
    %127 = arith.cmpi eq, %arg2, %c0_i32_129 : i32
    %128 = arith.extui %127 : i1 to i32
    %c0_i32_130 = arith.constant 0 : i32
    %129 = arith.cmpi ne, %128, %c0_i32_130 : i32
    scf.if %129 {
      %c0_131 = arith.constant 0 : index
      %c0_132 = arith.constant 0 : index
      %130 = vector.load %arg9[%c0_131, %c0_132] : memref<8x128xf32, #tpu.memory_space<vmem>>, vector<8x128xf32>
      %cst_133 = arith.constant dense<0.000000e+00> : vector<8xf32>
      %131 = vector.multi_reduction <add>, %130, %cst_133 [1] : vector<8x128xf32> to vector<8xf32>
      %132 = vector.shape_cast %131 : vector<8xf32> to vector<8x1xf32>
      %c0_134 = arith.constant 0 : index
      %c0_135 = arith.constant 0 : index
      %133 = vector.load %arg10[%c0_134, %c0_135] : memref<8x128xf32, #tpu.memory_space<vmem>>, vector<8x128xf32>
      %cst_136 = arith.constant dense<0.000000e+00> : vector<8xf32>
      %134 = vector.multi_reduction <add>, %133, %cst_136 [1] : vector<8x128xf32> to vector<8xf32>
      %135 = vector.shape_cast %134 : vector<8xf32> to vector<8x1xf32>
      %cst_137 = arith.constant 3.906250e-03 : f32
      %136 = vector.broadcast %cst_137 : f32 to vector<8x1xf32>
      %137 = arith.mulf %132, %136 : vector<8x1xf32>
      %cst_138 = arith.constant 3.906250e-03 : f32
      %138 = vector.broadcast %cst_138 : f32 to vector<8x1xf32>
      %139 = arith.mulf %135, %138 : vector<8x1xf32>
      %140 = arith.mulf %137, %137 : vector<8x1xf32>
      %141 = arith.subf %139, %140 : vector<8x1xf32>
      %cst_139 = arith.constant 0.000000e+00 : f32
      %142 = vector.broadcast %cst_139 : f32 to vector<8x1xf32>
      %143 = arith.maximumf %141, %142 : vector<8x1xf32>
      %c0_140 = arith.constant 0 : index
      %c0_141 = arith.constant 0 : index
      %c0_142 = arith.constant 0 : index
      %144 = vector.load %arg7[%c0_140, %c0_141, %c0_142] : memref<1x8x1xf32, #tpu.memory_space<vmem>>, vector<1x8x1xf32>
      %145 = vector.shape_cast %144 : vector<1x8x1xf32> to vector<8x1xf32>
      %146 = vector.shape_cast %137 : vector<8x1xf32> to vector<1x8x1xf32>
      tpu.vector_store %arg7[%c0_140, %c0_141, %c0_142], %146 {strides = array<i32>} : memref<1x8x1xf32, #tpu.memory_space<vmem>>, vector<1x8x1xf32>,
      %cst_143 = arith.constant 9.99999974E-6 : f32
      %147 = vector.broadcast %cst_143 : f32 to vector<8x1xf32>
      %148 = arith.addf %143, %147 : vector<8x1xf32>
      %149 = math.rsqrt %148 : vector<8x1xf32>
      %c0_144 = arith.constant 0 : index
      %c0_145 = arith.constant 0 : index
      %c0_146 = arith.constant 0 : index
      %150 = vector.load %arg8[%c0_144, %c0_145, %c0_146] : memref<1x8x1xf32, #tpu.memory_space<vmem>>, vector<1x8x1xf32>
      %151 = vector.shape_cast %150 : vector<1x8x1xf32> to vector<8x1xf32>
      %152 = vector.shape_cast %149 : vector<8x1xf32> to vector<1x8x1xf32>
      tpu.vector_store %arg8[%c0_144, %c0_145, %c0_146], %152 {strides = array<i32>} : memref<1x8x1xf32, #tpu.memory_space<vmem>>, vector<1x8x1xf32>,
    } else {
    }
    return
  }
  func.func @transform_0(%arg0: i32, %arg1: i32, %arg2: i32) -> (i32, i32, i32, i32) {
    %c0_i32 = arith.constant 0 : i32
    %c0_i32_0 = arith.constant 0 : i32
    %c0_i32_1 = arith.constant 0 : i32
    return %arg0, %arg2, %c0_i32, %c0_i32_0 : i32, i32, i32, i32
  }
  func.func @transform_1(%arg0: i32, %arg1: i32, %arg2: i32) -> (i32, i32, i32) {
    %c0_i32 = arith.constant 0 : i32
    %c0_i32_0 = arith.constant 0 : i32
    %c0_i32_1 = arith.constant 0 : i32
    return %c0_i32, %arg1, %c0_i32_0 : i32, i32, i32
  }
  func.func @transform_2(%arg0: i32, %arg1: i32, %arg2: i32) -> (i32, i32) {
    %c0_i32 = arith.constant 0 : i32
    %c0_i32_0 = arith.constant 0 : i32
    return %c0_i32, %arg2 : i32, i32
  }
  func.func @transform_3(%arg0: i32, %arg1: i32, %arg2: i32) -> (i32, i32, i32) {
    %c0_i32 = arith.constant 0 : i32
    return %arg0, %arg1, %arg2 : i32, i32, i32
  }
  func.func @transform_4(%arg0: i32, %arg1: i32, %arg2: i32) -> (i32, i32, i32) {
    %c0_i32 = arith.constant 0 : i32
    %c0_i32_0 = arith.constant 0 : i32
    return %arg0, %arg1, %c0_i32 : i32, i32, i32
  }
  func.func @transform_5(%arg0: i32, %arg1: i32, %arg2: i32) -> (i32, i32, i32) {
    %c0_i32 = arith.constant 0 : i32
    %c0_i32_0 = arith.constant 0 : i32
    return %arg0, %arg1, %c0_i32 : i32, i32, i32
  }
}

</mosaic_0001>

<bundles_post_ra>
// kernel: tpu_custom_call.1
= control target key start
LH: loop header
LB: loop body
LE: loop exit
PB: predicated region body
PF: predicated region fallthrough
CT: control target
= control target key end

     0   :  { %11 = vsyncpa [#allocation5], 0  ;;  %s2359_s0 = inlined_call_operand.vmem [shape: bf16[2,1,4,512], index: 0, kind: input, shape index: {}]   ;;  %s2360_s1 = inlined_call_operand.vmem [shape: bf16[9,8,4], index: 1, kind: input, shape index: {}]   ;;  %s2361_s2 = inlined_call_operand.vmem [shape: f32[1,384], index: 2, kind: input, shape index: {}]   ;;  %s2362_s3 = inlined_call_operand.hbm [shape: f32[2,8,384], index: 3, kind: output, shape index: {0}]   ;;  %s2363_s4 = inlined_call_operand.vmem [shape: f32[2,8,1], index: 4, kind: output, shape index: {1}]   ;;  %s2364_s5 = inlined_call_operand.vmem [shape: f32[2,8,1], index: 5, kind: output, shape index: {2}]  }
   0x1   :  { %13 = vsyncpa [#allocation5 + $0x1], 0  ;;  %s2128_s18 = smov 0   ;;  %s2130_s19 = smov 0  }
   0x2   :  { %s2132_s20 = smov 0   ;;  %s2134_s21 = smov 0  }
   0x3   :  { %s2136_s22 = smov 0   ;;  %s2138_s23 = smov 0  }
   0x4 LB: > { %s1809_s24 = sadd.s32 4294967295, %s2083_s23   ;;  %s1810_s25 = sadd.s32 4294967294, %s2083_s23   ;;  %s2083_s23 = sphi %s2138_s23, %s19_s23   ;;  %s2079_s22 = sphi %s2136_s22, %s2371_s22   ;;  %s2075_s21 = sphi %s2134_s21, %s2370_s21   ;;  %s2071_s20 = sphi %s2132_s20, %s2369_s20   ;;  %s2067_s19 = sphi %s2130_s19, %s2368_s19   ;;  %s2063_s18 = sphi %s2128_s18, %s2367_s18  }
   0x5   : > { %s38_s26 = sadd.s32 1, %s2079_s22  ;;  %s129_s27 = sadd.s32 1, %s2071_s20 }
   0x6   : > { %p40_p0 = scmp.ge.s32.totalorder %s38_s26, 2  ;;  %p139_p1 = scmp.ne.s32.totalorder %s2071_s20, %s2067_s19 }
   0x7   : > { %p140_p2 = scmp.eq.s32.totalorder %s1809_s24, 1  ;;  %p145_p3 = scmp.ne.s32.totalorder %s2067_s19, %s2063_s18 }
   0x8   : > { %s2373_s26 = smov (%p40_p0, %s38_s26), 0  ;;  %p146_p5 = scmp.eq.s32.totalorder %s1810_s25, 1 }
   0x9   : > { %p2168_p4 = por %p140_p2, %p139_p1  ;;  %s122_s29 = ssub.s32 %s2079_s22, %s2373_s26 }
   0xa   : > { %p1815_p6 = scmp.ge.s32.totalorder %s2083_s23, 1  ;;  %p127_p7 = scmp.eq.s32.totalorder %s122_s29, 0 }
   0xb   : > { %p2175_p8 = por %p146_p5, %p145_p3  ;;  %p247_p9 = scmp.lt.s32.totalorder %s2083_s23, 3 }
   0xc   : > { %s2181_s6 = scalar_select %p127_p7, %s2071_s20, %s129_s27  }
   0xd   : > { %p248_p10 = pnand %p1815_p6, %p247_p9 }
   0xe   : > { %p301_p11 = scmp.lt.s32.totalorder (!%p248_p10), %s2075_s21, 1  ;;  %s2089_s12 = smov (!%p248_p10), 127  }
   0xf   : > { %251 = sbr.rel (%p248_p10) target bundleno = 575 (0x23f), region = 32  ;;  %s2090_s15 = smov (!%p248_p10), 126  }
  0x10   : > { %s2091_s16 = smov (!%p248_p10), 110   ;;  %s2092_s17 = smov (!%p248_p10), 109  }
  0x11   : > { %s2093_s24 = smov (!%p248_p10), 108   ;;  %s2094_s25 = smov (!%p248_p10), 92  }
  0x12   : > { %s2095_s27 = smov (!%p248_p10), 91   ;;  %s2096_s29 = smov (!%p248_p10), 90  }
  0x13   : > { %s280_s10 = sand.u32 (!%p248_p10), 1, %s2067_s19   ;;  %s2097_s13 = smov (!%p248_p10), [#allocation4]  }
  0x14   : > { %v348_v0 = vlaneseq  ;;  %v2085_v1 = vmov 1983009808   ;;  %v2086_v3 = vmov 0   ;;  %s302_s7 = scalar_select %p301_p11, %s2075_s21, 1  ;;  %v2087_v5 = vmov 0.0  }
  0x15   : > { %v346_v2 = vunpack.c.l.s4 %v2085_v1  ;;  %406 = vmatprep.mubr.bf16.mxu0 %v2086_v3  ;;  %1880 = vmatprep.subr.bf16.mxu1 %v2087_v5  ;;  %vm2088_vm0 = vmmov 0   ;;  %vm364_vm1 = vcmask 1041408   ;;  %v341_v20 = vld [vmem:[%s2360_s1] sm:$0xf]  ;;  %vm360_vm2 = vcmask 31744   ;;  %s2011_s14 = sshll.u32 %s2097_s13, 4  ;;  %s2012_s14 = int_to_ptr.vmem [resolvable:$false] %s2011_s14 }
  0x16   : > { %v349_v4 = vshrl.u32 %v348_v0, 7  ;;  %1882 = vmatprep.mubr.msk.bf16.mxu1 %vm2088_vm0, %v2087_v5  ;;  %s2189_s8 = sshll.u32 %s302_s7, 3  ;;  %vm487_vm3 = vcmask 1039360   ;;  %v1823_v30 = vld [vmem:[%s2360_s1 + $0x4] sm:$0xf]  ;;  %vm622_vm4 = vcmask 1031168  }
  0x17   : > { %v347_v6 = vunpack.c.0.s8 %v346_v2  ;;  %s309_s11 = scalar_lea.vmem %s2359_s0, %s2189_s8  ;;  %v1827_v40 = vld [vmem:[%s2360_s1 + $0x8] sm:$0xf]  ;;  %vm757_vm5 = vcmask 900096   ;;  %v1831_v50 = vld [vmem:[%s2360_s1 + $0xc] sm:$0xf]  ;;  %vm892_vm6 = vcmask 891904  }
  0x18   : > { %v460_v8 = vld [vmem:[%s309_s11] sm:$0xff]  ;;  %v1835_v60 = vld [vmem:[%s2360_s1 + $0x10] sm:$0xf]  ;;  %vm1027_vm7 = vcmask 883712   ;;  %vm1162_vm8 = vcmask 752640   ;;  %vm1297_vm9 = vcmask 744448  }
  0x19   : > { %v350_v7 = vsub.s32 %v347_v6, %v349_v4  ;;  %v342_v9 = vld [vmem:[%s309_s11] sm:$0x3f]  ;;  %v462_v11 = vcombine.high %v460_v8, %v460_v8  ;;  %vm1432_vm10 = vcmask 736256   ;;  %s1934_s11 = smul.u32 24, %s280_s10 }
  0x1a   : > { %v344_v13 = vcombine.high %v342_v9, %v342_v9 }
  0x1b   : > { %v469_v10 = vrot.slane %v460_v8, %v350_v7  ;;  %v351_v12 = vrot.slane %v342_v9, %v350_v7  ;;  %v476_v15 = vrot.slane %v462_v11, %v350_v7  ;;  %v1839_v8 = vld [vmem:[%s2360_s1 + $0x14] sm:$0xf] }
  0x1c   : > { %v358_v18 = vrot.slane %v344_v13, %v350_v7 }
  0x1d   : > { %479 = vrot.lane.b32.xlu0 %v469_v10, %s2089_s12  ;;  %v477_v14 = vcombine.high %v469_v10, %v469_v10  ;;  %v359_v16 = vcombine.high %v351_v12, %v351_v12  ;;  %v366_v17 = vsel %vm364_vm1, %v351_v12, 0  ;;  %483 = vrot.lane.b32.xlu1 %v476_v15, %s2089_s12  ;;  %v478_v19 = vcombine.high %v476_v15, %v476_v15 }
  0x1e   : > { %v372_v21 = vsel %vm364_vm1, %v358_v18, 0  ;;  %v1843_v18 = vld [vmem:[%s2360_s1 + $0x18] sm:$0xf] }
  0x1f   : > { %1820 = vmatprep.subr.msk.bf16.mxu0 %vm364_vm1, %v359_v16  ;;  %1881 = vmatpush3.bf16.msra.mxu1 %v372_v21 }
  0x20   : > { %389 = vmatpush1.bf16.msra.mxu0 %v366_v17  ;;  %1886 = vmatprep.subr.bf16.mxu1 %v2087_v5 }
  0x21   : > { %481 = vrot.lane.b32.xlu0 %v477_v14, %s2089_s12  ;;  %485 = vrot.lane.b32.xlu1 %v478_v19, %s2089_s12 }
  0x22   : > { %1883 = vmatmul.mubr.msk.bf16.vlgmr.msra.gmra.mxu1 %vm360_vm2, %v341_v20 }
  0x23   : > { %1821 = vmatmul.mubr.msk.bf16.vlgmr.msra.gmra.mxu0 %vm360_vm2, %v341_v20  ;;  %1888 = vmatprep.mubr.msk.bf16.mxu1 %vm2088_vm0, %v2087_v5 }
  0x24   : > { %535 = vmatprep.mubr.bf16.mxu0 %v2086_v3 }
  0x25   : > { %614 = vrot.lane.b32.xlu0 %v469_v10, %s2090_s15  ;;  %616 = vrot.lane.b32.xlu1 %v477_v14, %s2090_s15 }
  0x29   : > { %618 = vrot.lane.b32.xlu0 %v476_v15, %s2090_s15  ;;  %620 = vrot.lane.b32.xlu1 %v478_v19, %s2090_s15  ;;  %s2013_s15 = scalar_lea.vmem %s2012_s14, 768 }
  0x2d   : > { %749 = vrot.lane.b32.xlu0 %v469_v10, %s2091_s16  ;;  %751 = vrot.lane.b32.xlu1 %v477_v14, %s2091_s16 }
  0x31   : > { %753 = vrot.lane.b32.xlu0 %v476_v15, %s2091_s16  ;;  %755 = vrot.lane.b32.xlu1 %v478_v19, %s2091_s16 }
  0x35   : > { %884 = vrot.lane.b32.xlu0 %v469_v10, %s2092_s17  ;;  %886 = vrot.lane.b32.xlu1 %v477_v14, %s2092_s17 }
  0x39   : > { %888 = vrot.lane.b32.xlu0 %v476_v15, %s2092_s17  ;;  %890 = vrot.lane.b32.xlu1 %v478_v19, %s2092_s17 }
  0x3d   : > { %1019 = vrot.lane.b32.xlu0 %v469_v10, %s2093_s24  ;;  %1021 = vrot.lane.b32.xlu1 %v477_v14, %s2093_s24 }
  0x41   : > { %1023 = vrot.lane.b32.xlu0 %v476_v15, %s2093_s24  ;;  %1025 = vrot.lane.b32.xlu1 %v478_v19, %s2093_s24  ;;  %s282_s24 = scalar_lea.vmem [#allocation4], %s1934_s11  ;;  %s1598_s11 = scalar_lea.sflag [#allocation5], %s280_s10 }
  0x45   : > { %1154 = vrot.lane.b32.xlu0 %v469_v10, %s2094_s25  ;;  %1156 = vrot.lane.b32.xlu1 %v477_v14, %s2094_s25 }
  0x49   : > { %1158 = vrot.lane.b32.xlu0 %v476_v15, %s2094_s25  ;;  %1160 = vrot.lane.b32.xlu1 %v478_v19, %s2094_s25  ;;  %s1935_s25 = smul.u32 384, %s2075_s21 }
  0x4b   : > { %s1628_s9 = scalar_lea.hbm %s2362_s3, %s1935_s25 }
  0x4d   : > { %1289 = vrot.lane.b32.xlu0 %v469_v10, %s2095_s27  ;;  %1291 = vrot.lane.b32.xlu1 %v477_v14, %s2095_s27 }
  0x51   : > { %1293 = vrot.lane.b32.xlu0 %v476_v15, %s2095_s27  ;;  %1295 = vrot.lane.b32.xlu1 %v478_v19, %s2095_s27  ;;  %s1630_s27 = sshll.u32 %s282_s24, 4  ;;  %s1631_s27 = int_to_ptr.vmem [resolvable:$true] %s1630_s27 }
  0x52   : > { %s2007_s12 = scalar_lea.vmem %s1631_s27, 384  ;;  %p2014_p1 = scmp.lt.s32.totalorder %s1631_s27, %s2012_s14 }
  0x53   : > { %p2008_p12 = scmp.ne.s32.totalorder %s1631_s27, %s2007_s12  ;;  %p2015_p2 = scmp.lt.s32.totalorder %s2013_s15, %s2007_s12 }
  0x55   : > { %1424 = vrot.lane.b32.xlu0 %v469_v10, %s2096_s29  ;;  %1426 = vrot.lane.b32.xlu1 %v477_v14, %s2096_s29  ;;  %p2009_p13 = pnand %p2008_p12, %p2168_p4  ;;  %p2016_p3 = por %p2015_p2, %p2014_p1 }
  0x57   : > { %p2010_p0 = pneg %p2009_p13 }
  0x59   : > { %1428 = vrot.lane.b32.xlu0 %v476_v15, %s2096_s29  ;;  %1430 = vrot.lane.b32.xlu1 %v478_v19, %s2096_s29  ;;  %p2017_p5 = pnand %p2016_p3, %p2010_p0 }
  0x8f   : > { %v480_v22 = vpop.permute.xlu0 %479  ;;  %v484_v23 = vpop.permute.xlu1 %483 }
  0x93   : > { %v482_v24 = vpop.permute.xlu0 %481  ;;  %v486_v28 = vpop.permute.xlu1 %485 }
  0x94   : > { %v488_v25 = vsel %vm487_vm3, %v480_v22, %v482_v24  ;;  %v489_v26 = vsel %vm487_vm3, %v482_v24, %v484_v23  ;;  %v490_v29 = vsel %vm487_vm3, %v484_v23, %v486_v28  ;;  %v1847_v28 = vld [vmem:[%s2360_s1 + $0x1c] sm:$0xf] }
  0x95   : > { %v495_v27 = vsel %vm364_vm1, %v488_v25, 0  ;;  %1824 = vmatprep.subr.msk.bf16.mxu0 %vm364_vm1, %v489_v26  ;;  %v501_v31 = vsel %vm364_vm1, %v490_v29, 0 }
  0x96   : > { %518 = vmatpush1.bf16.msra.mxu0 %v495_v27  ;;  %1887 = vmatpush3.bf16.msra.mxu1 %v501_v31 }
  0x97   : > { %v615_v32 = vpop.permute.xlu0 %614  ;;  %v617_v33 = vpop.permute.xlu1 %616  ;;  %1892 = vmatprep.subr.bf16.mxu1 %v2087_v5 }
  0x98   : > { %v623_v34 = vsel %vm622_vm4, %v615_v32, %v617_v33 }
  0x99   : > { %1825 = vmatmul.mubr.msk.bf16.vlgmr.msra.gmra.mxu0 %vm360_vm2, %v1823_v30  ;;  %1889 = vmatmul.mubr.msk.bf16.vlgmr.msra.gmra.mxu1 %vm360_vm2, %v1823_v30  ;;  %v630_v37 = vsel %vm364_vm1, %v623_v34, 0 }
  0x9a   : > { %670 = vmatprep.mubr.bf16.mxu0 %v2086_v3  ;;  %1894 = vmatprep.mubr.msk.bf16.mxu1 %vm2088_vm0, %v2087_v5 }
  0x9b   : > { %v619_v35 = vpop.permute.xlu0 %618  ;;  %v621_v38 = vpop.permute.xlu1 %620 }
  0x9c   : > { %v624_v36 = vsel %vm622_vm4, %v617_v33, %v619_v35  ;;  %v625_v39 = vsel %vm622_vm4, %v619_v35, %v621_v38  ;;  %v1851_v38 = vld [vmem:[%s2360_s1 + $0x20] sm:$0xf] }
  0x9d   : > { %1828 = vmatprep.subr.msk.bf16.mxu0 %vm364_vm1, %v624_v36  ;;  %v636_v41 = vsel %vm364_vm1, %v625_v39, 0 }
  0x9e   : > { %653 = vmatpush1.bf16.msra.mxu0 %v630_v37  ;;  %1893 = vmatpush3.bf16.msra.mxu1 %v636_v41 }
  0x9f   : > { %v750_v42 = vpop.permute.xlu0 %749  ;;  %v752_v43 = vpop.permute.xlu1 %751  ;;  %1898 = vmatprep.subr.bf16.mxu1 %v2087_v5 }
  0xa0   : > { %v758_v44 = vsel %vm757_vm5, %v750_v42, %v752_v43 }
  0xa1   : > { %1829 = vmatmul.mubr.msk.bf16.vlgmr.msra.gmra.mxu0 %vm360_vm2, %v1827_v40  ;;  %1895 = vmatmul.mubr.msk.bf16.vlgmr.msra.gmra.mxu1 %vm360_vm2, %v1827_v40  ;;  %v765_v47 = vsel %vm364_vm1, %v758_v44, 0 }
  0xa2   : > { %805 = vmatprep.mubr.bf16.mxu0 %v2086_v3  ;;  %1900 = vmatprep.mubr.msk.bf16.mxu1 %vm2088_vm0, %v2087_v5 }
  0xa3   : > { %v754_v45 = vpop.permute.xlu0 %753  ;;  %v756_v48 = vpop.permute.xlu1 %755 }
  0xa4   : > { %v759_v46 = vsel %vm757_vm5, %v752_v43, %v754_v45  ;;  %v760_v49 = vsel %vm757_vm5, %v754_v45, %v756_v48 }
  0xa5   : > { %1832 = vmatprep.subr.msk.bf16.mxu0 %vm364_vm1, %v759_v46  ;;  %v771_v51 = vsel %vm364_vm1, %v760_v49, 0 }
  0xa6   : > { %788 = vmatpush1.bf16.msra.mxu0 %v765_v47  ;;  %1899 = vmatpush3.bf16.msra.mxu1 %v771_v51 }
  0xa7   : > { %v885_v52 = vpop.permute.xlu0 %884  ;;  %v887_v53 = vpop.permute.xlu1 %886  ;;  %1904 = vmatprep.subr.bf16.mxu1 %v2087_v5 }
  0xa8   : > { %v893_v54 = vsel %vm892_vm6, %v885_v52, %v887_v53 }
  0xa9   : > { %1833 = vmatmul.mubr.msk.bf16.vlgmr.msra.gmra.mxu0 %vm360_vm2, %v1831_v50  ;;  %1901 = vmatmul.mubr.msk.bf16.vlgmr.msra.gmra.mxu1 %vm360_vm2, %v1831_v50  ;;  %v900_v57 = vsel %vm364_vm1, %v893_v54, 0 }
  0xaa   : > { %940 = vmatprep.mubr.bf16.mxu0 %v2086_v3  ;;  %1906 = vmatprep.mubr.msk.bf16.mxu1 %vm2088_vm0, %v2087_v5 }
  0xab   : > { %v889_v55 = vpop.permute.xlu0 %888  ;;  %v891_v58 = vpop.permute.xlu1 %890 }
  0xac   : > { %v894_v56 = vsel %vm892_vm6, %v887_v53, %v889_v55  ;;  %v895_v59 = vsel %vm892_vm6, %v889_v55, %v891_v58 }
  0xad   : > { %1836 = vmatprep.subr.msk.bf16.mxu0 %vm364_vm1, %v894_v56  ;;  %v906_v61 = vsel %vm364_vm1, %v895_v59, 0 }
  0xae   : > { %923 = vmatpush1.bf16.msra.mxu0 %v900_v57  ;;  %1905 = vmatpush3.bf16.msra.mxu1 %v906_v61 }
  0xaf   : > { %v1020_v62 = vpop.permute.xlu0 %1019  ;;  %v1022_v63 = vpop.permute.xlu1 %1021  ;;  %1910 = vmatprep.subr.bf16.mxu1 %v2087_v5 }
  0xb0   : > { %v1028_v0 = vsel %vm1027_vm7, %v1020_v62, %v1022_v63 }
  0xb1   : > { %1837 = vmatmul.mubr.msk.bf16.vlgmr.msra.gmra.mxu0 %vm360_vm2, %v1835_v60  ;;  %1907 = vmatmul.mubr.msk.bf16.vlgmr.msra.gmra.mxu1 %vm360_vm2, %v1835_v60  ;;  %v1035_v4 = vsel %vm364_vm1, %v1028_v0, 0 }
  0xb2   : > { %1075 = vmatprep.mubr.bf16.mxu0 %v2086_v3  ;;  %1912 = vmatprep.mubr.msk.bf16.mxu1 %vm2088_vm0, %v2087_v5 }
  0xb3   : > { %v1024_v1 = vpop.permute.xlu0 %1023  ;;  %v1026_v6 = vpop.permute.xlu1 %1025 }
  0xb4   : > { %v1029_v2 = vsel %vm1027_vm7, %v1022_v63, %v1024_v1  ;;  %v1030_v7 = vsel %vm1027_vm7, %v1024_v1, %v1026_v6 }
  0xb5   : > { %1840 = vmatprep.subr.msk.bf16.mxu0 %vm364_vm1, %v1029_v2  ;;  %v1041_v9 = vsel %vm364_vm1, %v1030_v7, 0 }
  0xb6   : > { %1058 = vmatpush1.bf16.msra.mxu0 %v1035_v4  ;;  %1911 = vmatpush3.bf16.msra.mxu1 %v1041_v9 }
  0xb7   : > { %v1155_v10 = vpop.permute.xlu0 %1154  ;;  %v1157_v11 = vpop.permute.xlu1 %1156  ;;  %1916 = vmatprep.subr.bf16.mxu1 %v2087_v5 }
  0xb8   : > { %v1163_v12 = vsel %vm1162_vm8, %v1155_v10, %v1157_v11 }
  0xb9   : > { %1841 = vmatmul.mubr.msk.bf16.vlgmr.msra.gmra.mxu0 %vm360_vm2, %v1839_v8  ;;  %1913 = vmatmul.mubr.msk.bf16.vlgmr.msra.gmra.mxu1 %vm360_vm2, %v1839_v8  ;;  %v1170_v15 = vsel %vm364_vm1, %v1163_v12, 0 }
  0xba   : > { %1210 = vmatprep.mubr.bf16.mxu0 %v2086_v3  ;;  %1918 = vmatprep.mubr.msk.bf16.mxu1 %vm2088_vm0, %v2087_v5 }
  0xbb   : > { %v1159_v13 = vpop.permute.xlu0 %1158  ;;  %v1161_v16 = vpop.permute.xlu1 %1160 }
  0xbc   : > { %v1164_v14 = vsel %vm1162_vm8, %v1157_v11, %v1159_v13  ;;  %v1165_v17 = vsel %vm1162_vm8, %v1159_v13, %v1161_v16 }
  0xbd   : > { %1844 = vmatprep.subr.msk.bf16.mxu0 %vm364_vm1, %v1164_v14  ;;  %v1176_v19 = vsel %vm364_vm1, %v1165_v17, 0 }
  0xbe   : > { %1193 = vmatpush1.bf16.msra.mxu0 %v1170_v15  ;;  %1917 = vmatpush3.bf16.msra.mxu1 %v1176_v19 }
  0xbf   : > { %v1290_v20 = vpop.permute.xlu0 %1289  ;;  %v1292_v21 = vpop.permute.xlu1 %1291  ;;  %1922 = vmatprep.subr.bf16.mxu1 %v2087_v5 }
  0xc0   : > { %v1298_v22 = vsel %vm1297_vm9, %v1290_v20, %v1292_v21 }
  0xc1   : > { %1845 = vmatmul.mubr.msk.bf16.vlgmr.msra.gmra.mxu0 %vm360_vm2, %v1843_v18  ;;  %1919 = vmatmul.mubr.msk.bf16.vlgmr.msra.gmra.mxu1 %vm360_vm2, %v1843_v18  ;;  %v1305_v25 = vsel %vm364_vm1, %v1298_v22, 0 }
  0xc2   : > { %1345 = vmatprep.mubr.bf16.mxu0 %v2086_v3  ;;  %1924 = vmatprep.mubr.msk.bf16.mxu1 %vm2088_vm0, %v2087_v5 }
  0xc3   : > { %v1294_v23 = vpop.permute.xlu0 %1293  ;;  %v1296_v26 = vpop.permute.xlu1 %1295 }
  0xc4   : > { %v1299_v24 = vsel %vm1297_vm9, %v1292_v21, %v1294_v23  ;;  %v1300_v27 = vsel %vm1297_vm9, %v1294_v23, %v1296_v26 }
  0xc5   : > { %1848 = vmatprep.subr.msk.bf16.mxu0 %vm364_vm1, %v1299_v24  ;;  %v1311_v29 = vsel %vm364_vm1, %v1300_v27, 0 }
  0xc6   : > { %1328 = vmatpush1.bf16.msra.mxu0 %v1305_v25  ;;  %1923 = vmatpush3.bf16.msra.mxu1 %v1311_v29 }
  0xc7   : > { %v1425_v30 = vpop.permute.xlu0 %1424  ;;  %v1427_v31 = vpop.permute.xlu1 %1426  ;;  %1928 = vmatprep.subr.bf16.mxu1 %v2087_v5 }
  0xc8   : > { %v1433_v32 = vsel %vm1432_vm10, %v1425_v30, %v1427_v31 }
  0xc9   : > { %1849 = vmatmul.mubr.msk.bf16.vlgmr.msra.gmra.mxu0 %vm360_vm2, %v1847_v28  ;;  %1925 = vmatmul.mubr.msk.bf16.vlgmr.msra.gmra.mxu1 %vm360_vm2, %v1847_v28  ;;  %v1440_v35 = vsel %vm364_vm1, %v1433_v32, 0 }
  0xca   : > { %1480 = vmatprep.mubr.bf16.mxu0 %v2086_v3  ;;  %1930 = vmatprep.mubr.msk.bf16.mxu1 %vm2088_vm0, %v2087_v5 }
  0xcb   : > { %v1429_v33 = vpop.permute.xlu0 %1428  ;;  %v1431_v36 = vpop.permute.xlu1 %1430 }
  0xcc   : > { %v1434_v34 = vsel %vm1432_vm10, %v1427_v31, %v1429_v33  ;;  %v1435_v37 = vsel %vm1432_vm10, %v1429_v33, %v1431_v36 }
  0xcd   : > { %1852 = vmatprep.subr.msk.bf16.mxu0 %vm364_vm1, %v1434_v34  ;;  %v1446_v3 = vsel %vm364_vm1, %v1435_v37, 0 }
  0xce   : > { %1463 = vmatpush1.bf16.msra.mxu0 %v1440_v35  ;;  %1929 = vmatpush3.bf16.msra.mxu1 %v1446_v3 }
  0xd1   : > { %1853 = vmatmul.mubr.msk.bf16.vlgmr.msra.gmra.mxu0 %vm360_vm2, %v1851_v38  ;;  %1931 = vmatmul.mubr.msk.bf16.vlgmr.msra.gmra.mxu1 %vm360_vm2, %v1851_v38 }
  0xe2   : > { %v449_v5 = vpop.f32.mrf.mxu1 }
  0xe3   : > { %v408_v39 = vpop.f32.mrf.mxu0 }
  0xe4   : > { %v1884_v41 = vpop.f32.mrf.mxu1 }
  0xe5   : > { %v410_v40 = vpop.f32.mrf.mxu0 }
  0xe6   : > { %v452_v43 = vpop.f32.mrf.mxu1 }
  0xe7   : > { %v412_v42 = vpop.f32.mrf.mxu0 }
  0xe8   : > { %v1885_v45 = vpop.f32.mrf.mxu1 }
  0xe9   : > { %v413_v44 = vpop.f32.mrf.mxu0 }
 0x159   : > { %v537_v46 = vpop.f32.mrf.mxu0  ;;  %v578_v48 = vpop.f32.mrf.mxu1 }
 0x15a   : > { %v587_v27 = vadd.f32 %v537_v46, %v408_v39  ;;  %v589_v31 = vadd.f32 %v578_v48, %v449_v5 }
 0x15b   : > { %v539_v47 = vpop.f32.mrf.mxu0  ;;  %v1890_v50 = vpop.f32.mrf.mxu1 }
 0x15c   : > { %v588_v30 = vadd.f32 %v539_v47, %v410_v40 }
 0x15d   : > { %v541_v49 = vpop.f32.mrf.mxu0  ;;  %v581_v52 = vpop.f32.mrf.mxu1 }
 0x15f   : > { %v542_v51 = vpop.f32.mrf.mxu0  ;;  %v1891_v53 = vpop.f32.mrf.mxu1 }
 0x161   : > { %v672_v54 = vpop.f32.mrf.mxu0  ;;  %v713_v56 = vpop.f32.mrf.mxu1 }
 0x162   : > { %v722_v32 = vadd.f32 %v672_v54, %v587_v27  ;;  %v724_v36 = vadd.f32 %v713_v56, %v589_v31 }
 0x163   : > { %v674_v55 = vpop.f32.mrf.mxu0  ;;  %v1896_v58 = vpop.f32.mrf.mxu1 }
 0x164   : > { %v723_v35 = vadd.f32 %v674_v55, %v588_v30  ;;  %v1855_v58 = vld [vmem:[%s2361_s2] ss:$0 sm:$0xff] }
 0x165   : > { %v676_v57 = vpop.f32.mrf.mxu0  ;;  %v716_v60 = vpop.f32.mrf.mxu1 }
 0x167   : > { %v677_v59 = vpop.f32.mrf.mxu0  ;;  %v1897_v61 = vpop.f32.mrf.mxu1 }
 0x169   : > { %v807_v62 = vpop.f32.mrf.mxu0  ;;  %v848_v0 = vpop.f32.mrf.mxu1 }
 0x16a   : > { %v857_v37 = vadd.f32 %v807_v62, %v722_v32  ;;  %v859_v42 = vadd.f32 %v848_v0, %v724_v36  ;;  %v1856_v0 = vld [vmem:[%s2361_s2 + $0x1] ss:$0 sm:$0xff] }
 0x16b   : > { %v809_v63 = vpop.f32.mrf.mxu0  ;;  %v1902_v2 = vpop.f32.mrf.mxu1 }
 0x16c   : > { %v858_v41 = vadd.f32 %v809_v63, %v723_v35 }
 0x16d   : > { %v811_v1 = vpop.f32.mrf.mxu0  ;;  %v851_v6 = vpop.f32.mrf.mxu1 }
 0x16e   : > { %v1857_v1 = vld [vmem:[%s2361_s2 + $0x2] ss:$0 sm:$0xff] }
 0x16f   : > { %v812_v4 = vpop.f32.mrf.mxu0  ;;  %v1903_v7 = vpop.f32.mrf.mxu1 }
 0x171   : > { %v942_v8 = vpop.f32.mrf.mxu0  ;;  %v983_v10 = vpop.f32.mrf.mxu1 }
 0x172   : > { %v992_v43 = vadd.f32 %v942_v8, %v857_v37  ;;  %v994_v46 = vadd.f32 %v983_v10, %v859_v42 }
 0x173   : > { %v944_v9 = vpop.f32.mrf.mxu0  ;;  %v1908_v12 = vpop.f32.mrf.mxu1 }
 0x174   : > { %v993_v39 = vadd.f32 %v944_v9, %v858_v41 }
 0x175   : > { %v946_v11 = vpop.f32.mrf.mxu0  ;;  %v986_v14 = vpop.f32.mrf.mxu1 }
 0x177   : > { %v947_v13 = vpop.f32.mrf.mxu0  ;;  %v1909_v15 = vpop.f32.mrf.mxu1 }
 0x179   : > { %v1077_v16 = vpop.f32.mrf.mxu0  ;;  %v1118_v18 = vpop.f32.mrf.mxu1 }
 0x17a   : > { %v1127_v49 = vadd.f32 %v1077_v16, %v992_v43  ;;  %v1129_v48 = vadd.f32 %v1118_v18, %v994_v46 }
 0x17b   : > { %v1079_v17 = vpop.f32.mrf.mxu0  ;;  %v1914_v20 = vpop.f32.mrf.mxu1 }
 0x17c   : > { %v1128_v47 = vadd.f32 %v1079_v17, %v993_v39 }
 0x17d   : > { %v1081_v19 = vpop.f32.mrf.mxu0  ;;  %v1121_v22 = vpop.f32.mrf.mxu1 }
 0x17f   : > { %v1082_v21 = vpop.f32.mrf.mxu0  ;;  %v1915_v23 = vpop.f32.mrf.mxu1 }
 0x181   : > { %v1212_v24 = vpop.f32.mrf.mxu0  ;;  %v1253_v26 = vpop.f32.mrf.mxu1 }
 0x182   : > { %v1262_v50 = vadd.f32 %v1212_v24, %v1127_v49  ;;  %v1264_v54 = vadd.f32 %v1253_v26, %v1129_v48 }
 0x183   : > { %v1214_v25 = vpop.f32.mrf.mxu0  ;;  %v1920_v29 = vpop.f32.mrf.mxu1 }
 0x184   : > { %v1263_v53 = vadd.f32 %v1214_v25, %v1128_v47 }
 0x185   : > { %v1216_v28 = vpop.f32.mrf.mxu0  ;;  %v1256_v34 = vpop.f32.mrf.mxu1 }
 0x187   : > { %v1217_v33 = vpop.f32.mrf.mxu0  ;;  %v1921_v38 = vpop.f32.mrf.mxu1 }
 0x189   : > { %v1347_v3 = vpop.f32.mrf.mxu0  ;;  %v1388_v45 = vpop.f32.mrf.mxu1 }
 0x18a   : > { %v1397_v55 = vadd.f32 %v1347_v3, %v1262_v50  ;;  %v1399_v60 = vadd.f32 %v1388_v45, %v1264_v54 }
 0x18b   : > { %v1349_v44 = vpop.f32.mrf.mxu0  ;;  %v1926_v40 = vpop.f32.mrf.mxu1 }
 0x18c   : > { %v1398_v59 = vadd.f32 %v1349_v44, %v1263_v53 }
 0x18d   : > { %v1351_v5 = vpop.f32.mrf.mxu0  ;;  %v1391_v52 = vpop.f32.mrf.mxu1 }
 0x18f   : > { %v1352_v51 = vpop.f32.mrf.mxu0  ;;  %v1927_v56 = vpop.f32.mrf.mxu1 }
 0x191   : > { %v1482_v57 = vpop.f32.mrf.mxu0  ;;  %v1523_v63 = vpop.f32.mrf.mxu1 }
 0x192   : > { %v1532_v61 = vadd.f32 %v1482_v57, %v1397_v55  ;;  %v1534_v4 = vadd.f32 %v1523_v63, %v1399_v60 }
 0x193   : > { %v1484_v62 = vpop.f32.mrf.mxu0  ;;  %v1932_v8 = vpop.f32.mrf.mxu1 }
 0x194   : > { %1535 = vst [vmem:[%s282_s24] sm:$0xff] %v1532_v61  ;;  %v1533_v2 = vadd.f32 %v1484_v62, %v1398_v59  ;;  %v1548_v6 = vmul.f32 %v1855_v58, %v1532_v61  ;;  %1537 = vst [vmem:[%s282_s24 + $0x10] sm:$0xff] %v1534_v4  ;;  %v1572_v10 = vmul.f32 %v1857_v1, %v1534_v4 }
 0x195   : > { %v1486_v7 = vpop.f32.mrf.mxu0  ;;  %v1526_v12 = vpop.f32.mrf.mxu1 }
 0x196   : > { %1536 = vst [vmem:[%s282_s24 + $0x8] sm:$0xff] %v1533_v2  ;;  %v1560_v9 = vmul.f32 %v1856_v0, %v1533_v2  ;;  %v1550_v14 = vmul.f32 %v1548_v6, %v1548_v6  ;;  %v1574_v19 = vmul.f32 %v1572_v10, %v1572_v10 }
 0x197   : > { %v1487_v11 = vpop.f32.mrf.mxu0  ;;  %v1933_v16 = vpop.f32.mrf.mxu1 }
 0x198   : > { %v1561_v13 = vadd.f32 %v1560_v9, %v1548_v6  ;;  %v1562_v15 = vmul.f32 %v1560_v9, %v1560_v9 }
 0x19a   : > { %v1573_v17 = vadd.f32 %v1572_v10, %v1561_v13  ;;  %v1563_v18 = vadd.f32 %v1562_v15, %v1550_v14 }
 0x19c   : > { %1582 = vadd.xlane.f32.xlu0 %v1573_v17  ;;  %v1575_v20 = vadd.f32 %v1574_v19, %v1563_v18 }
 0x19e   : > { %1585 = vadd.xlane.f32.xlu1 %v1575_v20 }
 0x19f   : > { %2020 = shalt.err (!%p2017_p5)
}
 0x1a0   : > { %s2021_s21 = scalar_lea.hbm %s1628_s9, 384  ;;  %s2025_s17 = scalar_lea.hbm %s2362_s3, 768 }
 0x1a1   : > { %p2022_p6 = scmp.ne.s32.totalorder %s1628_s9, %s2021_s21  ;;  %p2026_p10 = scmp.lt.s32.totalorder %s1628_s9, %s2362_s3 }
 0x1a2   : > { %p2027_p11 = scmp.lt.s32.totalorder %s2025_s17, %s2021_s21 }
 0x1a3   : > { %p2023_p7 = pnand %p2022_p6, %p2168_p4 }
 0x1a4   : > { %p2028_p12 = por %p2027_p11, %p2026_p10 }
 0x1a5   : > { %p2024_p9 = pneg %p2023_p7 }
 0x1a7   : > { %p2029_p13 = pnand %p2028_p12, %p2024_p9 }
 0x1a9   : > { %2032 = shalt.err (!%p2029_p13)
}
 0x1aa   : > { %1936 = dma.vmem_to_hbm [thread:$0]  (%p2168_p4), %s1631_s27, 384, %s1628_s9, %s1598_s11   ;;  %vm1592_vm11 = vcmask 7168  }
 0x1ab   : > { %s326_s12 = scalar_lea.vmem %s2363_s4, %s2189_s8  ;;  %s333_s14 = scalar_lea.vmem %s2364_s5, %s2189_s8 }
 0x225   : > { %v1583_v21 = vpop.xlane.xlu0 %1582 }
 0x226   : > { %v1587_v22 = vmul.f32 0.00390625, %v1583_v21 }
 0x227   : > { %v1586_v23 = vpop.xlane.xlu1 %1585 }
 0x228   : > { %v1589_v24 = vmul.f32 %v1587_v22, %v1587_v22  ;;  %1593 = vst.msk [vmem:[%s326_s12] sm:$0xff] %vm1592_vm11, %v1587_v22  ;;  %v1588_v25 = vmul.f32 0.00390625, %v1586_v23 }
 0x22a   : > { %v1590_v26 = vsub.f32 %v1588_v25, %v1589_v24 }
 0x22c   : > { %v1591_v27 = vmax.f32 %v1590_v26, 0.0 }
 0x22e   : > { %v1594_v28 = vadd.f32 1e-05, %v1591_v27 }
 0x230   : > { %2005 = vrsqrt.f32 %v1594_v28 }
 0x23d   : > { %v2006_v29 = vpop.eup %2005 }
 0x23e   : > { %1596 = vst.msk [vmem:[%s333_s14] sm:$0xff] %vm1592_vm11, %v2006_v29 }
 0x23f PF: > { %p1942_p4 = scmp.ge.s32.totalorder %s2083_s23, 2  ;;  %s1648_s27 = sand.u32 1, %s2063_s18  }
 0x240   : > { %s1649_s9 = scalar_lea.sflag [#allocation5], %s1648_s27 }
 0x241   : > { %p1939_p0 = pnand %p1942_p4, %p2175_p8 }
 0x243   : > { %p1940_p1 = pneg %p1939_p0 }
 0x245   : > { %2058 = dma.done.wait (%p1940_p1), %s1649_s9, 384  }
 0x246   : > { %2060 = vsyncadd (%p1940_p1), %s1649_s9, 4294966912  ;;  %s19_s23 = sadd.s32 1, %s2083_s23   ;;  %s2367_s18 = smov %s2067_s19 }
 0x247   : > { %p16_p2 = scmp.ge.s32.totalorder %s19_s23, 4   ;;  %s2368_s19 = smov %s2071_s20 }
 0x248   : > { %s2369_s20 = smov %s2181_s6  ;;  %s2370_s21 = smov %s2079_s22 }
 0x249   : > { %s2371_s22 = smov %s2373_s26  ;;  %18 = sbr.rel (!%p16_p2) target bundleno = 4 (0x4), region = 113 }
 0x24e   :  { %1674 = vsyncpa [#allocation5], 1 }
 0x24f   :  { %1676 = vsyncpa [#allocation5 + $0x1], 1 }

</bundles_post_ra>
